<compile_context>
chip_gen: v6e
topology: v6e:2x2x1
jax: 0.10.0
libtpu: 0.0.40
codegen_flags: <defaults>
</compile_context>

<pallas_src>
import functools

import jax
import jax.numpy as jnp
from jax.experimental import pallas as pl
from jax.experimental.pallas import tpu as pltpu


# ----------------------------------------------------------------------------
# Kernels
# ----------------------------------------------------------------------------
def _gather_tile_rows(nodes_ref, adj_ref, rows_ref, sem, tile):
    """DMA-gather adj[nodes[t*tile + r]] for r in [0, tile) into VMEM.

    nodes_ref : SMEM [B_pad] int32   (scalar prefetch)
    adj_ref   : HBM  [N, K]  int32   (memory_space=pl.ANY, raw ref)
    rows_ref  : VMEM [tile, K] int32 (scratch destination)
    sem       : DMA semaphore array of shape (1,)
    """
    base = pl.program_id(0) * tile

    @pl.loop(0, tile)
    def _issue(r):
        node = nodes_ref[base + r]
        pltpu.make_async_copy(adj_ref.at[pl.ds(node, 1)],
                              rows_ref.at[pl.ds(r, 1)],
                              sem.at[0]).start()

    @pl.loop(0, tile)
    def _drain(r):
        # A wait only needs a matching transfer shape + the semaphore; one
        # per-copy-sized wait for each issued copy fully drains the semaphore.
        pltpu.make_async_copy(adj_ref.at[pl.ds(0, 1)],
                              rows_ref.at[pl.ds(0, 1)],
                              sem.at[0]).wait()


def _select_kernel(nodes_ref, sel_ref, adj_ref, out_ref, rows_ref, sem, *,
                   tile, num_neighs):
    """Gather a tile of rows, then pick `num_neighs` permuted columns (int32)."""
    _gather_tile_rows(nodes_ref, adj_ref, rows_ref, sem, tile)

    rows = rows_ref[...]            # (tile, K) int32
    sel = sel_ref[...]              # (num_neighs, K) int32 one-hot (hoisted)

    cols = []
    for j in range(num_neighs):     # static unroll; num_neighs is small
        picked = rows * sel[j:j + 1, :]                        # (tile, K)
        cols.append(jnp.sum(picked, axis=1, keepdims=True))    # (tile, 1)
    out_ref[...] = cols[0] if num_neighs == 1 else jnp.concatenate(cols, axis=1)


def _identity_kernel(nodes_ref, adj_ref, out_ref, rows_ref, sem, *, tile):
    """num_neighs=None path: pure batched row gather, int32 end-to-end."""
    _gather_tile_rows(nodes_ref, adj_ref, rows_ref, sem, tile)
    out_ref[...] = rows_ref[...]


# ----------------------------------------------------------------------------
# Wrappers
# ----------------------------------------------------------------------------
def _pick_tile(batch):
    """Tile size + padded batch.  <=128 nodes -> single tile, else 128/tile."""
    if batch <= 128:
        return batch, batch
    tile = 128
    return tile, ((batch + tile - 1) // tile) * tile


@functools.partial(jax.jit, static_argnames=("num_neighs",))
def _neigh_sample(adj, nodes, perm_sel, num_neighs):
    N, K = adj.shape
    B = nodes.shape[0]
    tile, b_pad = _pick_tile(B)
    num_tiles = b_pad // tile

    # Pad with node 0 (always a valid row); padded outputs are sliced away.
    nodes_pad = jnp.zeros((b_pad,), jnp.int32).at[:B].set(nodes)

    # Hoisted integer one-hot selection matrix: sel[j, k] = (k == perm[j]).
    sel = (perm_sel[:, None] == jnp.arange(K, dtype=jnp.int32)[None, :]
           ).astype(jnp.int32)

    kernel = functools.partial(_select_kernel, tile=tile, num_neighs=num_neighs)
    out = pl.pallas_call(
        kernel,
        out_shape=jax.ShapeDtypeStruct((b_pad, num_neighs), jnp.int32),
        grid_spec=pltpu.PrefetchScalarGridSpec(
            num_scalar_prefetch=1,                 # nodes -> SMEM
            grid=(num_tiles,),
            in_specs=[
                # Selection matrix: constant block index -> VMEM-resident.
                pl.BlockSpec((num_neighs, K), lambda t, nodes_r: (0, 0)),
                # Adjacency stays in HBM; rows are gathered manually.
                pl.BlockSpec(memory_space=pl.ANY),
            ],
            out_specs=pl.BlockSpec((tile, num_neighs),
                                   lambda t, nodes_r: (t, 0)),
            scratch_shapes=[pltpu.VMEM((tile, K), jnp.int32),
                            pltpu.SemaphoreType.DMA((1,))],
        ),
        compiler_params=pltpu.CompilerParams(
            dimension_semantics=("parallel",)),
    )(nodes_pad, sel, adj)
    return out[:B]


@jax.jit
def _neigh_gather(adj, nodes):
    N, K = adj.shape
    B = nodes.shape[0]
    tile, b_pad = _pick_tile(B)
    num_tiles = b_pad // tile
    nodes_pad = jnp.zeros((b_pad,), jnp.int32).at[:B].set(nodes)

    kernel = functools.partial(_identity_kernel, tile=tile)
    out = pl.pallas_call(
        kernel,
        out_shape=jax.ShapeDtypeStruct((b_pad, K), jnp.int32),
        grid_spec=pltpu.PrefetchScalarGridSpec(
            num_scalar_prefetch=1,
            grid=(num_tiles,),
            in_specs=[pl.BlockSpec(memory_space=pl.ANY)],
            out_specs=pl.BlockSpec((tile, K), lambda t, nodes_r: (t, 0)),
            scratch_shapes=[pltpu.VMEM((tile, K), jnp.int32),
                            pltpu.SemaphoreType.DMA((1,))],
        ),
        compiler_params=pltpu.CompilerParams(
            dimension_semantics=("parallel",)),
    )(nodes_pad, adj)
    return out[:B]


class NeighSampler:
    """JAX/Pallas port of the PyTorch NeighSampler module."""

    def __init__(self, adj):
        self.adj = jnp.asarray(adj, dtype=jnp.int32)

    def __call__(self, nodes, num_neighs, key=None):
        N, K = self.adj.shape
        nodes = jnp.asarray(nodes, dtype=jnp.int32)

        if num_neighs is None:
            # Pure row gather, no permutation / slicing.
            perm = jnp.arange(K, dtype=jnp.int32)
            return _neigh_gather(self.adj, nodes), perm

        n = int(min(int(num_neighs), K))
        # torch.randperm(adj.shape[1]) equivalent (deterministic via key).
        perm = jax.random.permutation(key, K).astype(jnp.int32)
        out = _neigh_sample(self.adj, nodes, perm[:n], n)
        return out, perm


# ----------------------------------------------------------------------------
# Demo / self-check
# ----------------------------------------------------------------------------
if __name__ == "__main__":
    key = jax.random.PRNGKey(0)
    k_adj, k_nodes, k_nodes2, k_perm = jax.random.split(key, 4)

    N, K = 64, 16          # N nodes, K neighbor slots per node
    num_neighs = 8

    adj = jax.random.randint(k_adj, (N, K), 0, N, dtype=jnp.int32)
    sampler = NeighSampler(adj)

    # Case 1: small batch (single tile).
    B1 = 8
    nodes1 = jax.random.randint(k_nodes, (B1,), 0, N, dtype=jnp.int32)
    out1, perm1 = sampler(nodes1, num_neighs, k_perm)
    out1 = jax.block_until_ready(out1)
    ref1 = adj[nodes1][:, perm1[:num_neighs]]
    assert out1.shape == (B1, num_neighs), out1.shape
    assert out1.dtype == jnp.int32, out1.dtype
    assert bool(jnp.all(out1 == ref1)), "mismatch vs reference (small batch)"

    # Case 2: batch > tile (exercises multi-tile grid + batch padding).
    B2 = 200
    nodes2 = jax.random.randint(k_nodes2, (B2,), 0, N, dtype=jnp.int32)
    out2, perm2 = sampler(nodes2, num_neighs, k_perm)
    out2 = jax.block_until_ready(out2)
    ref2 = adj[nodes2][:, perm2[:num_neighs]]
    assert out2.shape == (B2, num_neighs), out2.shape
    assert bool(jnp.all(out2 == ref2)), "mismatch vs reference (large batch)"

    # Case 3: num_neighs=None path (pure row gather, identity columns).
    out3, _ = sampler(nodes1, None, k_perm)
    out3 = jax.block_until_ready(out3)
    assert bool(jnp.all(out3 == adj[nodes1])), "mismatch on identity path"

    print("KERNEL_OK")
</pallas_src>

<mosaic_0001>
module attributes {stable_mosaic.version = 11 : i64} {
  func.func @_select_kernel(%arg0: i32, %arg1: memref<8xi32, #tpu.memory_space<smem>>, %arg2: memref<8x16xi32, #tpu.memory_space<vmem>>, %arg3: memref<64x16xi32, #tpu.memory_space<any>>, %arg4: memref<8x8xi32, #tpu.memory_space<vmem>>, %arg5: memref<8x16xi32, #tpu.memory_space<vmem>>, %arg6: memref<1x!tpu.dma_semaphore, #tpu.memory_space<semaphore_mem>>) attributes {dimension_semantics = [#tpu.dimension_semantics<parallel>], iteration_bounds = array<i64: 1>, scalar_prefetch = 1 : i64, scratch_operands = 2 : i64, tpu.core_type = #tpu.core_type<tc>, window_params = [{pipeline_mode = #tpu.pipeline_mode<synchronous>, transform_indices = @transform_0, window_bounds = array<i64: 8, 16>}, {}, {transform_indices = @transform_2, window_bounds = array<i64: 8, 8>}]} {
    %c8_i32 = arith.constant 8 : i32
    %0 = arith.muli %arg0, %c8_i32 : i32
    %c0_i32 = arith.constant 0 : i32
    %c8_i32_0 = arith.constant 8 : i32
    %1 = arith.addi %c0_i32, %c8_i32_0 : i32
    %c1_i32 = arith.constant 1 : i32
    scf.for %arg7 = %c0_i32 to %1 step %c1_i32  : i32 {
      %c1_i32_17 = arith.constant 1 : i32
      %47 = arith.muli %arg7, %c1_i32_17 : i32
      %c0_i32_18 = arith.constant 0 : i32
      %48 = arith.addi %c0_i32_18, %47 : i32
      %49 = arith.addi %0, %48 : i32
      %50 = arith.index_cast %49 : i32 to index
      %51 = memref.load %arg1[%50] : memref<8xi32, #tpu.memory_space<smem>>
      %c0_i32_19 = arith.constant 0 : i32
      %c0_i32_20 = arith.constant 0 : i32
      %52 = tpu.memref_slice %arg3[%51, %c0_i32_20] : memref<64x16xi32, #tpu.memory_space<any>> -> memref<1x16xi32, #tpu.memory_space<any>>
      %c0_i32_21 = arith.constant 0 : i32
      %53 = tpu.memref_slice %arg5[%48, %c0_i32_21] : memref<8x16xi32, #tpu.memory_space<vmem>> -> memref<1x16xi32, #tpu.memory_space<vmem>>
      %54 = tpu.memref_slice %arg6[%c0_i32_19] : memref<1x!tpu.dma_semaphore, #tpu.memory_space<semaphore_mem>> -> memref<1x!tpu.dma_semaphore, #tpu.memory_space<semaphore_mem>>
      %55 = tpu.memref_squeeze %54 : memref<1x!tpu.dma_semaphore, #tpu.memory_space<semaphore_mem>> -> memref<!tpu.dma_semaphore, #tpu.memory_space<semaphore_mem>>
      tpu.enqueue_dma source(%52 : memref<1x16xi32, #tpu.memory_space<any>>) target(%53 : memref<1x16xi32, #tpu.memory_space<vmem>>) target_semaphore(%55 : memref<!tpu.dma_semaphore, #tpu.memory_space<semaphore_mem>>)
    }
    %c8_i32_1 = arith.constant 8 : i32
    %c0_i32_2 = arith.constant 0 : i32
    %c8_i32_3 = arith.constant 8 : i32
    %2 = arith.addi %c0_i32_2, %c8_i32_3 : i32
    %c1_i32_4 = arith.constant 1 : i32
    scf.for %arg7 = %c0_i32_2 to %2 step %c1_i32_4  : i32 {
      %c0_i32_17 = arith.constant 0 : i32
      %c0_i32_18 = arith.constant 0 : i32
      %c0_i32_19 = arith.constant 0 : i32
      %47 = tpu.memref_slice %arg3[%c0_i32_18, %c0_i32_19] : memref<64x16xi32, #tpu.memory_space<any>> -> memref<1x16xi32, #tpu.memory_space<any>>
      %c0_i32_20 = arith.constant 0 : i32
      %c0_i32_21 = arith.constant 0 : i32
      %48 = tpu.memref_slice %arg5[%c0_i32_20, %c0_i32_21] : memref<8x16xi32, #tpu.memory_space<vmem>> -> memref<1x16xi32, #tpu.memory_space<vmem>>
      %49 = tpu.memref_slice %arg6[%c0_i32_17] : memref<1x!tpu.dma_semaphore, #tpu.memory_space<semaphore_mem>> -> memref<1x!tpu.dma_semaphore, #tpu.memory_space<semaphore_mem>>
      %50 = tpu.memref_squeeze %49 : memref<1x!tpu.dma_semaphore, #tpu.memory_space<semaphore_mem>> -> memref<!tpu.dma_semaphore, #tpu.memory_space<semaphore_mem>>
      tpu.wait_dma2 semaphore(%50 : memref<!tpu.dma_semaphore, #tpu.memory_space<semaphore_mem>>) src(%47 : memref<1x16xi32, #tpu.memory_space<any>>) dst(%48 : memref<1x16xi32, #tpu.memory_space<vmem>>)
    }
    %c0 = arith.constant 0 : index
    %c0_5 = arith.constant 0 : index
    %3 = vector.load %arg5[%c0, %c0_5] : memref<8x16xi32, #tpu.memory_space<vmem>>, vector<8x16xi32>
    %c0_6 = arith.constant 0 : index
    %c0_7 = arith.constant 0 : index
    %4 = vector.load %arg2[%c0_6, %c0_7] : memref<8x16xi32, #tpu.memory_space<vmem>>, vector<8x16xi32>
    %5 = vector.extract_strided_slice %4 {offsets = [0, 0], sizes = [1, 16], strides = [1, 1]} : vector<8x16xi32> to vector<1x16xi32>
    %6 = vector.broadcast %5 : vector<1x16xi32> to vector<8x16xi32>
    %7 = arith.muli %3, %6 : vector<8x16xi32>
    %cst = arith.constant dense<0> : vector<8xi32>
    %8 = vector.multi_reduction <add>, %7, %cst [1] : vector<8x16xi32> to vector<8xi32>
    %9 = vector.shape_cast %8 : vector<8xi32> to vector<8x1xi32>
    %10 = vector.extract_strided_slice %4 {offsets = [1, 0], sizes = [1, 16], strides = [1, 1]} : vector<8x16xi32> to vector<1x16xi32>
    %11 = vector.broadcast %10 : vector<1x16xi32> to vector<8x16xi32>
    %12 = arith.muli %3, %11 : vector<8x16xi32>
    %cst_8 = arith.constant dense<0> : vector<8xi32>
    %13 = vector.multi_reduction <add>, %12, %cst_8 [1] : vector<8x16xi32> to vector<8xi32>
    %14 = vector.shape_cast %13 : vector<8xi32> to vector<8x1xi32>
    %15 = vector.extract_strided_slice %4 {offsets = [2, 0], sizes = [1, 16], strides = [1, 1]} : vector<8x16xi32> to vector<1x16xi32>
    %16 = vector.broadcast %15 : vector<1x16xi32> to vector<8x16xi32>
    %17 = arith.muli %3, %16 : vector<8x16xi32>
    %cst_9 = arith.constant dense<0> : vector<8xi32>
    %18 = vector.multi_reduction <add>, %17, %cst_9 [1] : vector<8x16xi32> to vector<8xi32>
    %19 = vector.shape_cast %18 : vector<8xi32> to vector<8x1xi32>
    %20 = vector.extract_strided_slice %4 {offsets = [3, 0], sizes = [1, 16], strides = [1, 1]} : vector<8x16xi32> to vector<1x16xi32>
    %21 = vector.broadcast %20 : vector<1x16xi32> to vector<8x16xi32>
    %22 = arith.muli %3, %21 : vector<8x16xi32>
    %cst_10 = arith.constant dense<0> : vector<8xi32>
    %23 = vector.multi_reduction <add>, %22, %cst_10 [1] : vector<8x16xi32> to vector<8xi32>
    %24 = vector.shape_cast %23 : vector<8xi32> to vector<8x1xi32>
    %25 = vector.extract_strided_slice %4 {offsets = [4, 0], sizes = [1, 16], strides = [1, 1]} : vector<8x16xi32> to vector<1x16xi32>
    %26 = vector.broadcast %25 : vector<1x16xi32> to vector<8x16xi32>
    %27 = arith.muli %3, %26 : vector<8x16xi32>
    %cst_11 = arith.constant dense<0> : vector<8xi32>
    %28 = vector.multi_reduction <add>, %27, %cst_11 [1] : vector<8x16xi32> to vector<8xi32>
    %29 = vector.shape_cast %28 : vector<8xi32> to vector<8x1xi32>
    %30 = vector.extract_strided_slice %4 {offsets = [5, 0], sizes = [1, 16], strides = [1, 1]} : vector<8x16xi32> to vector<1x16xi32>
    %31 = vector.broadcast %30 : vector<1x16xi32> to vector<8x16xi32>
    %32 = arith.muli %3, %31 : vector<8x16xi32>
    %cst_12 = arith.constant dense<0> : vector<8xi32>
    %33 = vector.multi_reduction <add>, %32, %cst_12 [1] : vector<8x16xi32> to vector<8xi32>
    %34 = vector.shape_cast %33 : vector<8xi32> to vector<8x1xi32>
    %35 = vector.extract_strided_slice %4 {offsets = [6, 0], sizes = [1, 16], strides = [1, 1]} : vector<8x16xi32> to vector<1x16xi32>
    %36 = vector.broadcast %35 : vector<1x16xi32> to vector<8x16xi32>
    %37 = arith.muli %3, %36 : vector<8x16xi32>
    %cst_13 = arith.constant dense<0> : vector<8xi32>
    %38 = vector.multi_reduction <add>, %37, %cst_13 [1] : vector<8x16xi32> to vector<8xi32>
    %39 = vector.shape_cast %38 : vector<8xi32> to vector<8x1xi32>
    %40 = vector.extract_strided_slice %4 {offsets = [7, 0], sizes = [1, 16], strides = [1, 1]} : vector<8x16xi32> to vector<1x16xi32>
    %41 = vector.broadcast %40 : vector<1x16xi32> to vector<8x16xi32>
    %42 = arith.muli %3, %41 : vector<8x16xi32>
    %cst_14 = arith.constant dense<0> : vector<8xi32>
    %43 = vector.multi_reduction <add>, %42, %cst_14 [1] : vector<8x16xi32> to vector<8xi32>
    %44 = vector.shape_cast %43 : vector<8xi32> to vector<8x1xi32>
    %45 = tpu.concatenate %9, %14, %19, %24, %29, %34, %39, %44 in 1 : vector<8x1xi32>, vector<8x1xi32>, vector<8x1xi32>, vector<8x1xi32>, vector<8x1xi32>, vector<8x1xi32>, vector<8x1xi32>, vector<8x1xi32> -> vector<8x8xi32>
    %c0_15 = arith.constant 0 : index
    %c0_16 = arith.constant 0 : index
    %46 = vector.load %arg4[%c0_15, %c0_16] : memref<8x8xi32, #tpu.memory_space<vmem>>, vector<8x8xi32>
    tpu.vector_store %arg4[%c0_15, %c0_16], %45 {strides = array<i32>} : memref<8x8xi32, #tpu.memory_space<vmem>>, vector<8x8xi32>,
    return
  }
  func.func @transform_0(%arg0: i32, %arg1: memref<8xi32, #tpu.memory_space<smem>>) -> (i32, i32) {
    %c0_i32 = arith.constant 0 : i32
    %c0_i32_0 = arith.constant 0 : i32
    %c0_i32_1 = arith.constant 0 : i32
    return %c0_i32, %c0_i32_0 : i32, i32
  }
  func.func @transform_2(%arg0: i32, %arg1: memref<8xi32, #tpu.memory_space<smem>>) -> (i32, i32) {
    %c0_i32 = arith.constant 0 : i32
    %c0_i32_0 = arith.constant 0 : i32
    return %arg0, %c0_i32 : i32, i32
  }
}

</mosaic_0001>

<bundles_post_ra>
// kernel: _neigh_sample.1
= control target key start
LH: loop header
LB: loop body
LE: loop exit
PB: predicated region body
PF: predicated region fallthrough
CT: control target
= control target key end

     0   :  { %s404_s0 = inlined_call_operand.vmem [shape: s32[8], index: 0, kind: input, shape index: {}]   ;;  %s405_s1 = inlined_call_operand.vmem [shape: s32[8,16], index: 1, kind: input, shape index: {}]   ;;  %s406_s2 = inlined_call_operand.vmem [shape: s32[64,16], index: 2, kind: input, shape index: {}]   ;;  %s407_s3 = inlined_call_operand.hbm [shape: s32[8,8], index: 3, kind: output, shape index: {}]  }
   0x1   :  { %s8_s14 = sshll.u32 %s404_s0, 4  ;;  %s9_s14 = int_to_ptr.vmem [resolvable:$true] %s8_s14 }
   0x2   :  { %s307_s15 = scalar_lea.vmem %s9_s14, 16  ;;  %p312_p1 = scmp.lt.s32.totalorder %s9_s14, %s9_s14 }
   0x3   :  { %p308_p0 = scmp.ne.s32.totalorder %s9_s14, %s307_s15  ;;  %p313_p2 = scmp.lt.s32.totalorder %s307_s15, %s307_s15 }
   0x5   :  { %p314_p3 = por %p313_p2, %p312_p1 }
   0x7   :  { %p315_p4 = pnand %p314_p3, %p308_p0 }
   0x9   :  { %318 = shalt.err (!%p315_p4)  }
   0xa   :  { %s361_s16 = smov [#allocation5]  }
   0xb   :  { %11 = dma.vmem_to_smem %s9_s14, 16, %s361_s16, [#allocation4] }
   0xc   :  { %347 = dma.done.wait [#allocation4], 16 }
   0xd   :  { %348 = vsyncadd [#allocation4], 4294967280 }
   0xe   :  { %13 = sfence }
   0xf   :  { %14 = vsyncpa [#allocation7], 0  ;;  %s353_s17 = smov 0  }
  0x10 LB: > { %s25_s18 = sld [smem:[#allocation5 + %s355_s17]]  ;;  %s27_s21 = scalar_lea.vmem [#allocation2], %s355_s17  ;;  %s355_s17 = sphi %s353_s17, %s23_s17  }
  0x16   : > { %s26_s20 = scalar_lea.vmem %s406_s2, %s25_s18 }
  0x17   : > { %v46_v0 = vld [vmem:[%s26_s20] sm:$0x1] }
  0x18   : > { %47 = vst [vmem:[%s27_s21] sm:$0x1] %v46_v0 }
  0x19   : > { %73 = vsyncadd [#allocation3], 16  ;;  %s23_s17 = sadd.s32 1, %s355_s17  }
  0x1a   : > { %p20_p5 = scmp.ge.s32.totalorder %s23_s17, 8  }
  0x1b   :  { %s357_s22 = smov (%p20_p5), 0  }
  0x1c   :  { %22 = sbr.rel (!%p20_p5) target bundleno = 16 (0x10), region = 80 }
  0x21 LB: > { %349 = dma.done.wait [#allocation3], 16  ;;  %s359_s22 = sphi %s357_s22, %s79_s22  }
  0x22   : > { %350 = vsyncadd [#allocation3], 4294967280  ;;  %s79_s22 = sadd.s32 1, %s359_s22  }
  0x23   : > { %p76_p6 = scmp.ge.s32.totalorder %s79_s22, 8  }
  0x24   :  { %v85_v1 = vlaneseq (%p76_p6)  ;;  %v84_v3 = vld [vmem:[%s405_s1] sm:$0xff] (%p76_p6)  ;;  %vm90_vm0 = vcmask (%p76_p6), 130048   ;;  %vm230_vm1 = vcmask (%p76_p6), 7168   ;;  %vm232_vm2 = vcmask (%p76_p6), 15360   ;;  %s362_s1 = smov (%p76_p6), [#allocation6]  }
  0x25   :  { %78 = sbr.rel (!%p76_p6) target bundleno = 33 (0x21), region = 91  ;;  %v83_v8 = vld [vmem:[#allocation2] sm:$0xff] (%p76_p6)  ;;  %vm234_vm3 = vcmask (%p76_p6), 23552   ;;  %vm236_vm4 = vcmask (%p76_p6), 31744   ;;  %vm238_vm5 = vcmask (%p76_p6), 39936   ;;  %vm240_vm6 = vcmask (%p76_p6), 48128  }
  0x26   :  { %v86_v2 = vshrl.u32 (%p76_p6), %v85_v1, 7  ;;  %s252_s2 = sshll.u32 (%p76_p6), %s362_s1, 4  ;;  %vm242_vm7 = vcmask (%p76_p6), 56320   ;;  %vm244_vm8 = vcmask (%p76_p6), 64512   ;;  %s253_s2 = int_to_ptr.vmem [resolvable:$true] %s252_s2 }
  0x27   :  { %s319_s25 = scalar_lea.vmem (%p76_p6), %s253_s2, 128  ;;  %p324_p8 = scmp.lt.s32.totalorder (%p76_p6), %s253_s2, %s253_s2 }
  0x28   :  { %v124_v4 = vsub.s32 (%p76_p6), 2, %v86_v2  ;;  %v87_v5 = vsub.s32 (%p76_p6), 0, %v86_v2  ;;  %v106_v6 = vsub.s32 (%p76_p6), 1, %v86_v2  ;;  %v142_v7 = vsub.s32 (%p76_p6), 3, %v86_v2  ;;  %p320_p7 = scmp.ne.s32.totalorder (%p76_p6), %s253_s2, %s319_s25  ;;  %p325_p9 = scmp.lt.s32.totalorder (%p76_p6), %s319_s25, %s319_s25 }
  0x29   :  { %v160_v9 = vsub.s32 (%p76_p6), 4, %v86_v2  ;;  %v178_v17 = vsub.s32 (%p76_p6), 5, %v86_v2  ;;  %v196_v22 = vsub.s32 (%p76_p6), 6, %v86_v2  ;;  %v214_v40 = vsub.s32 (%p76_p6), 7, %v86_v2 }
  0x2a   :  { %v125_v10 = vrot.slane %v84_v3, %v124_v4  ;;  %v88_v11 = vrot.slane %v84_v3, %v87_v5  ;;  %v107_v12 = vrot.slane %v84_v3, %v106_v6  ;;  %v143_v13 = vrot.slane %v84_v3, %v142_v7  ;;  %p326_p10 = por %p325_p9, %p324_p8 }
  0x2b   :  { %v161_v16 = vrot.slane %v84_v3, %v160_v9  ;;  %v179_v30 = vrot.slane %v84_v3, %v178_v17  ;;  %v197_v39 = vrot.slane %v84_v3, %v196_v22  ;;  %v215_v47 = vrot.slane %v84_v3, %v214_v40 }
  0x2c   :  { %v126_v14 = vmul.u32 %v125_v10, %v83_v8  ;;  %v89_v15 = vmul.u32 %v88_v11, %v83_v8  ;;  %p327_p11 = pnand %p326_p10, %p320_p7 }
  0x2d   :  { %v108_v18 = vmul.u32 %v107_v12, %v83_v8  ;;  %v144_v19 = vmul.u32 %v143_v13, %v83_v8 }
  0x2e   :  { %v127_v20 = vsel %vm90_vm0, %v126_v14, 0  ;;  %v91_v21 = vsel %vm90_vm0, %v89_v15, 0  ;;  %v162_v29 = vmul.u32 %v161_v16, %v83_v8  ;;  %v180_v38 = vmul.u32 %v179_v30, %v83_v8 }
  0x2f   :  { %v129_v23 = vshrl.u32 %v127_v20, 16  ;;  %v93_v24 = vshrl.u32 %v91_v21, 16  ;;  %v109_v25 = vsel %vm90_vm0, %v108_v18, 0  ;;  %v92_v26 = vand.u32 65535, %v91_v21 }
  0x30   :  { %v111_v27 = vshrl.u32 %v109_v25, 16  ;;  %v145_v28 = vsel %vm90_vm0, %v144_v19, 0  ;;  %v110_v35 = vand.u32 65535, %v109_v25  ;;  %v163_v37 = vsel %vm90_vm0, %v162_v29, 0 }
  0x31   :  { %v131_v31 = vcvt.s32.f32 %v129_v23  ;;  %v95_v32 = vcvt.s32.f32 %v93_v24  ;;  %v94_v34 = vcvt.s32.f32 %v92_v26  ;;  %v147_v36 = vshrl.u32 %v145_v28, 16 }
  0x32   :  { %v113_v33 = vcvt.s32.f32 %v111_v27  ;;  %v112_v41 = vcvt.s32.f32 %v110_v35  ;;  %v128_v43 = vand.u32 65535, %v127_v20  ;;  %v165_v44 = vshrl.u32 %v163_v37, 16 }
  0x33   :  { %134 = vadd.xlane.f32.xlu1 %v131_v31  ;;  %98 = vadd.xlane.f32.xlu0 %v95_v32  ;;  %v149_v42 = vcvt.s32.f32 %v147_v36  ;;  %v181_v45 = vsel %vm90_vm0, %v180_v38, 0  ;;  %v198_v46 = vmul.u32 %v197_v39, %v83_v8  ;;  %v146_v50 = vand.u32 65535, %v145_v28 }
  0x34   :  { %v130_v48 = vcvt.s32.f32 %v128_v43  ;;  %v167_v49 = vcvt.s32.f32 %v165_v44  ;;  %v183_v51 = vshrl.u32 %v181_v45, 16  ;;  %v216_v53 = vmul.u32 %v215_v47, %v83_v8 }
  0x35   :  { %v199_v52 = vsel %vm90_vm0, %v198_v46, 0  ;;  %v148_v54 = vcvt.s32.f32 %v146_v50  ;;  %v164_v56 = vand.u32 65535, %v163_v37  ;;  %v182_v61 = vand.u32 65535, %v181_v45 }
  0x36   :  { %v185_v55 = vcvt.s32.f32 %v183_v51  ;;  %v201_v57 = vshrl.u32 %v199_v52, 16  ;;  %v217_v58 = vsel %vm90_vm0, %v216_v53, 0  ;;  %v200_v1 = vand.u32 65535, %v199_v52 }
  0x37   :  { %116 = vadd.xlane.f32.xlu0 %v113_v33  ;;  %96 = vadd.xlane.f32.xlu1 %v94_v34  ;;  %v166_v59 = vcvt.s32.f32 %v164_v56  ;;  %v219_v62 = vshrl.u32 %v217_v58, 16  ;;  %v184_v63 = vcvt.s32.f32 %v182_v61  ;;  %v218_v2 = vand.u32 65535, %v217_v58 }
  0x38   :  { %v203_v60 = vcvt.s32.f32 %v201_v57  ;;  %v202_v3 = vcvt.s32.f32 %v200_v1 }
  0x39   :  { %v221_v0 = vcvt.s32.f32 %v219_v62  ;;  %v220_v4 = vcvt.s32.f32 %v218_v2 }
  0x3b   :  { %114 = vadd.xlane.f32.xlu0 %v112_v41  ;;  %152 = vadd.xlane.f32.xlu1 %v149_v42 }
  0x3f   :  { %132 = vadd.xlane.f32.xlu0 %v130_v48  ;;  %170 = vadd.xlane.f32.xlu1 %v167_v49 }
  0x43   :  { %150 = vadd.xlane.f32.xlu0 %v148_v54  ;;  %188 = vadd.xlane.f32.xlu1 %v185_v55 }
  0x47   :  { %168 = vadd.xlane.f32.xlu0 %v166_v59  ;;  %206 = vadd.xlane.f32.xlu1 %v203_v60 }
  0x4b   :  { %186 = vadd.xlane.f32.xlu0 %v184_v63  ;;  %224 = vadd.xlane.f32.xlu1 %v221_v0 }
  0x4f   :  { %204 = vadd.xlane.f32.xlu0 %v202_v3  ;;  %222 = vadd.xlane.f32.xlu1 %v220_v4 }
  0xbc   :  { %v135_v5 = vpop.xlane.xlu1 %134  ;;  %v99_v6 = vpop.xlane.xlu0 %98 }
  0xbd   :  { %v137_v15 = vcvt.f32.s32 %v135_v5  ;;  %v101_v17 = vcvt.f32.s32 %v99_v6 }
  0xbf   :  { %v138_v23 = vshll.u32 %v137_v15, 16  ;;  %v102_v30 = vshll.u32 %v101_v17, 16 }
  0xc0   :  { %v117_v7 = vpop.xlane.xlu0 %116  ;;  %v97_v8 = vpop.xlane.xlu1 %96 }
  0xc1   :  { %v119_v16 = vcvt.f32.s32 %v117_v7  ;;  %v100_v26 = vcvt.f32.s32 %v97_v8 }
  0xc3   :  { %v120_v25 = vshll.u32 %v119_v16, 16  ;;  %v103_v40 = vadd.s32 %v102_v30, %v100_v26 }
  0xc4   :  { %v115_v9 = vpop.xlane.xlu0 %114  ;;  %v153_v10 = vpop.xlane.xlu1 %152 }
  0xc5   :  { %v118_v18 = vcvt.f32.s32 %v115_v9  ;;  %v155_v19 = vcvt.f32.s32 %v153_v10 }
  0xc7   :  { %v121_v31 = vadd.s32 %v120_v25, %v118_v18  ;;  %v156_v32 = vshll.u32 %v155_v19, 16 }
  0xc8   :  { %v133_v11 = vpop.xlane.xlu0 %132  ;;  %v171_v12 = vpop.xlane.xlu1 %170 }
  0xc9   :  { %v136_v20 = vcvt.f32.s32 %v133_v11  ;;  %v173_v24 = vcvt.f32.s32 %v171_v12  ;;  %v231_v45 = vsel %vm230_vm1, %v103_v40, %v121_v31 }
  0xcb   :  { %v139_v33 = vadd.s32 %v138_v23, %v136_v20  ;;  %v174_v36 = vshll.u32 %v173_v24, 16 }
  0xcc   :  { %v151_v13 = vpop.xlane.xlu0 %150  ;;  %v189_v14 = vpop.xlane.xlu1 %188 }
  0xcd   :  { %v154_v27 = vcvt.f32.s32 %v151_v13  ;;  %v191_v28 = vcvt.f32.s32 %v189_v14  ;;  %v233_v49 = vsel %vm232_vm2, %v231_v45, %v139_v33 }
  0xcf   :  { %v157_v41 = vadd.s32 %v156_v32, %v154_v27  ;;  %v192_v42 = vshll.u32 %v191_v28, 16 }
  0xd0   :  { %v169_v21 = vpop.xlane.xlu0 %168  ;;  %v207_v22 = vpop.xlane.xlu1 %206 }
  0xd1   :  { %v172_v29 = vcvt.f32.s32 %v169_v21  ;;  %v209_v37 = vcvt.f32.s32 %v207_v22  ;;  %v235_v53 = vsel %vm234_vm3, %v233_v49, %v157_v41 }
  0xd3   :  { %v175_v43 = vadd.s32 %v174_v36, %v172_v29  ;;  %v210_v50 = vshll.u32 %v209_v37, 16 }
  0xd4   :  { %v187_v34 = vpop.xlane.xlu0 %186  ;;  %v225_v35 = vpop.xlane.xlu1 %224 }
  0xd5   :  { %v190_v38 = vcvt.f32.s32 %v187_v34  ;;  %v227_v39 = vcvt.f32.s32 %v225_v35  ;;  %v237_v54 = vsel %vm236_vm4, %v235_v53, %v175_v43 }
  0xd7   :  { %v228_v44 = vshll.u32 %v227_v39, 16  ;;  %v193_v46 = vadd.s32 %v192_v42, %v190_v38 }
  0xd8   :  { %v205_v47 = vpop.xlane.xlu0 %204  ;;  %v223_v48 = vpop.xlane.xlu1 %222 }
  0xd9   :  { %v208_v51 = vcvt.f32.s32 %v205_v47  ;;  %v226_v52 = vcvt.f32.s32 %v223_v48  ;;  %v239_v57 = vsel %vm238_vm5, %v237_v54, %v193_v46 }
  0xdb   :  { %v211_v55 = vadd.s32 %v210_v50, %v208_v51  ;;  %v229_v56 = vadd.s32 %v228_v44, %v226_v52 }
  0xdd   :  { %v241_v58 = vsel %vm240_vm6, %v239_v57, %v211_v55 }
  0xde   :  { %v243_v59 = vsel %vm242_vm7, %v241_v58, %v229_v56 }
  0xdf   :  { %245 = vst.msk [vmem:[#allocation6] sm:$0xff] %vm244_vm8, %v243_v59 }
  0xe0   :  { %330 = shalt.err (!%p327_p11)
}
  0xe1   :  { %255 = dma.vmem_to_hbm [thread:$0]  %s253_s2, 128, %s407_s3, [#allocation7]  }
  0xe2   :  { %351 = dma.done.wait [#allocation7], 128  }
  0xe3   :  { %352 = vsyncadd [#allocation7], 4294967168 }
  0xe4   :  { %259 = vsyncpa [#allocation7], 1 }
  0xe5   :  { %260 = vsyncmov [#allocation3] }
  0xe8   :  { %s261_s28 = vpop.sfrf %260 }
  0xe9   :  { %p288_p12 = scmp.ne.s32.totalorder %s261_s28, 0 }
  0xeb   :  { %265 = shalt.err (%p288_p12)  }

</bundles_post_ra>
